<compile_context>
chip_gen: v6e
topology: v6e:2x2x1
jax: 0.10.0
libtpu: 0.0.40
codegen_flags: <defaults>
</compile_context>

<pallas_src>
import jax
import jax.numpy as jnp
from jax.experimental import pallas as pl
from jax.experimental.pallas import tpu as pltpu


def _mlp_kernel(x_ref, w1_ref, b1_ref, w2_ref, b2_ref, w3_ref, b3_ref, o_ref):
    """One batch tile of the fused MLP (batch-on-lanes layout).

    x_ref : (input_dim, TILE_B)          activations, batch on the lane axis
    w*    : (out_features, in_features)  PyTorch layout, resident across tiles
    b*    : (out_features, 1)
    o_ref : (out_dim, TILE_B)
    """
    x = x_ref[...]

    # ---- fc1 + ReLU -------------------------------------------------------
    w1 = w1_ref[...]
    if x.shape[0] == 1:
        # K == 1: a dot would occupy the MXU at <1% utilization; this is just
        # a broadcasted multiply-add on the VPU:
        #   h1[o, b] = w1[o, 0] * x[0, b] + b1[o, 0]
        h1 = w1 * x + b1_ref[...]
    else:
        h1 = jnp.dot(w1, x, preferred_element_type=jnp.float32) + b1_ref[...]
    h1 = jnp.maximum(h1, 0.0)

    # ---- fc2 + ReLU  (real MXU matmul: M=16, K=32, N=TILE_B) --------------
    h2 = jnp.dot(w2_ref[...], h1, preferred_element_type=jnp.float32) + b2_ref[...]
    h2 = jnp.maximum(h2, 0.0)

    # ---- mean head (K=16, N=TILE_B, no activation) ------------------------
    o_ref[...] = (
        jnp.dot(w3_ref[...], h2, preferred_element_type=jnp.float32) + b3_ref[...]
    )


def simple_feedforward_nn(x, params, *, tile_b=2048):
    """Forward pass of SimpleFeedForwardNN as one batch-tiled Pallas kernel.

    x: (B, input_dim) float32
    params (PyTorch layout): w1 (32, input_dim), b1 (32, 1),
                             w2 (16, 32),        b2 (16, 1),
                             w3 (out_dim, 16),   b3 (out_dim, 1)
    returns: (B, out_dim) float32
    """
    B, input_dim = x.shape
    out_dim = params["w3"].shape[0]

    # Batch tile: multiple of 128 (lane width), capped at `tile_b`, no larger
    # than needed for small batches. Pad the batch so every tile is full.
    tile_b = max(128, min(int(tile_b), 128 * pl.cdiv(B, 128)))
    b_pad = tile_b * pl.cdiv(B, tile_b)

    # Layout plumbing in the wrapper: batch goes onto the lane axis.
    x_t = jnp.pad(x.T, ((0, 0), (0, b_pad - B)))          # (input_dim, b_pad)

    grid = (b_pad // tile_b,)
    const = lambda i: (0, 0)  # weights / biases: same block every grid step

    out_t = pl.pallas_call(
        _mlp_kernel,
        out_shape=jax.ShapeDtypeStruct((out_dim, b_pad), jnp.float32),
        grid=grid,
        in_specs=[
            pl.BlockSpec((input_dim, tile_b), lambda i: (0, i)),   # x tile (streamed)
            pl.BlockSpec((32, input_dim), const),                  # w1 (resident)
            pl.BlockSpec((32, 1), const),                          # b1
            pl.BlockSpec((16, 32), const),                         # w2
            pl.BlockSpec((16, 1), const),                          # b2
            pl.BlockSpec((out_dim, 16), const),                    # w3
            pl.BlockSpec((out_dim, 1), const),                     # b3
        ],
        out_specs=pl.BlockSpec((out_dim, tile_b), lambda i: (0, i)),
        compiler_params=pltpu.CompilerParams(
            dimension_semantics=("parallel",),      # shard tiles across TCs on v7x
            vmem_limit_bytes=32 * 1024 * 1024,      # explicit; safe on v7x (64 MiB)
        ),
    )(x_t, params["w1"], params["b1"], params["w2"], params["b2"],
      params["w3"], params["b3"])

    return out_t[:, :B].T                                   # (B, out_dim)


def init_params(key, input_dim=1, output_val_dim=1):
    """Deterministic init mimicking nn.Linear (uniform(-1/sqrt(fan_in), +1/sqrt(fan_in))).

    Weights are kept in PyTorch layout (out_features, in_features); biases as
    (out_features, 1) so they broadcast over the lane (batch) axis in-kernel.
    """
    dims = [(input_dim, 32), (32, 16), (16, output_val_dim)]
    params = {}
    for idx, (fan_in, fan_out) in enumerate(dims, start=1):
        key, kw, kb = jax.random.split(key, 3)
        bound = 1.0 / jnp.sqrt(jnp.float32(fan_in))
        params[f"w{idx}"] = jax.random.uniform(
            kw, (fan_out, fan_in), jnp.float32, minval=-bound, maxval=bound)
        params[f"b{idx}"] = jax.random.uniform(
            kb, (fan_out, 1), jnp.float32, minval=-bound, maxval=bound)
    return params


def reference_forward(x, p):
    h1 = jnp.maximum(x @ p["w1"].T + p["b1"].T, 0.0)
    h2 = jnp.maximum(h1 @ p["w2"].T + p["b2"].T, 0.0)
    return h2 @ p["w3"].T + p["b3"].T


if __name__ == "__main__":
    key = jax.random.PRNGKey(0)
    key, kx = jax.random.split(key)
    input_dim, output_val_dim, batch = 1, 1, 8
    x = jax.random.normal(kx, (batch, input_dim), jnp.float32)
    params = init_params(key, input_dim, output_val_dim)

    out = simple_feedforward_nn(x, params)
    out = jax.block_until_ready(out)

    ref = reference_forward(x, params)
    assert out.shape == (batch, output_val_dim)
    assert jnp.allclose(out, ref, atol=1e-5, rtol=1e-5)
    print("KERNEL_OK")
</pallas_src>

<mosaic_0001>
module attributes {stable_mosaic.version = 11 : i64} {
  func.func @_mlp_kernel(%arg0: i32, %arg1: memref<1x128xf32, #tpu.memory_space<vmem>>, %arg2: memref<32x1xf32, #tpu.memory_space<vmem>>, %arg3: memref<32x1xf32, #tpu.memory_space<vmem>>, %arg4: memref<16x32xf32, #tpu.memory_space<vmem>>, %arg5: memref<16x1xf32, #tpu.memory_space<vmem>>, %arg6: memref<1x16xf32, #tpu.memory_space<vmem>>, %arg7: memref<1x1xf32, #tpu.memory_space<vmem>>, %arg8: memref<1x128xf32, #tpu.memory_space<vmem>>) attributes {dimension_semantics = [#tpu.dimension_semantics<parallel>], iteration_bounds = array<i64: 1>, scalar_prefetch = 0 : i64, scratch_operands = 0 : i64, tpu.core_type = #tpu.core_type<tc>, window_params = [{transform_indices = @transform_0, window_bounds = array<i64: 1, 128>}, {pipeline_mode = #tpu.pipeline_mode<synchronous>, transform_indices = @transform_1, window_bounds = array<i64: 32, 1>}, {pipeline_mode = #tpu.pipeline_mode<synchronous>, transform_indices = @transform_2, window_bounds = array<i64: 32, 1>}, {pipeline_mode = #tpu.pipeline_mode<synchronous>, transform_indices = @transform_3, window_bounds = array<i64: 16, 32>}, {pipeline_mode = #tpu.pipeline_mode<synchronous>, transform_indices = @transform_4, window_bounds = array<i64: 16, 1>}, {pipeline_mode = #tpu.pipeline_mode<synchronous>, transform_indices = @transform_5, window_bounds = array<i64: 1, 16>}, {pipeline_mode = #tpu.pipeline_mode<synchronous>, transform_indices = @transform_6, window_bounds = array<i64: 1, 1>}, {transform_indices = @transform_7, window_bounds = array<i64: 1, 128>}]} {
    %c0 = arith.constant 0 : index
    %c0_0 = arith.constant 0 : index
    %0 = vector.load %arg1[%c0, %c0_0] : memref<1x128xf32, #tpu.memory_space<vmem>>, vector<1x128xf32>
    %c0_1 = arith.constant 0 : index
    %c0_2 = arith.constant 0 : index
    %1 = vector.load %arg2[%c0_1, %c0_2] : memref<32x1xf32, #tpu.memory_space<vmem>>, vector<32x1xf32>
    %2 = vector.broadcast %1 : vector<32x1xf32> to vector<32x128xf32>
    %3 = vector.broadcast %0 : vector<1x128xf32> to vector<32x128xf32>
    %4 = arith.mulf %2, %3 : vector<32x128xf32>
    %c0_3 = arith.constant 0 : index
    %c0_4 = arith.constant 0 : index
    %5 = vector.load %arg3[%c0_3, %c0_4] : memref<32x1xf32, #tpu.memory_space<vmem>>, vector<32x1xf32>
    %6 = vector.broadcast %5 : vector<32x1xf32> to vector<32x128xf32>
    %7 = arith.addf %4, %6 : vector<32x128xf32>
    %cst = arith.constant 0.000000e+00 : f32
    %8 = vector.broadcast %cst : f32 to vector<32x128xf32>
    %9 = arith.maximumf %7, %8 : vector<32x128xf32>
    %c0_5 = arith.constant 0 : index
    %c0_6 = arith.constant 0 : index
    %10 = vector.load %arg4[%c0_5, %c0_6] : memref<16x32xf32, #tpu.memory_space<vmem>>, vector<16x32xf32>
    %cst_7 = arith.constant dense<0.000000e+00> : vector<16x128xf32>
    %11 = tpu.matmul %10, %9, %cst_7 {dimension_numbers = #tpu.dot_dimension_numbers<[1], [0], [0], [1], [0, 0, 1, 1], [], []>} : vector<16x32xf32>, vector<32x128xf32>, vector<16x128xf32> -> vector<16x128xf32>
    %c0_8 = arith.constant 0 : index
    %c0_9 = arith.constant 0 : index
    %12 = vector.load %arg5[%c0_8, %c0_9] : memref<16x1xf32, #tpu.memory_space<vmem>>, vector<16x1xf32>
    %13 = vector.broadcast %12 : vector<16x1xf32> to vector<16x128xf32>
    %14 = arith.addf %11, %13 : vector<16x128xf32>
    %cst_10 = arith.constant 0.000000e+00 : f32
    %15 = vector.broadcast %cst_10 : f32 to vector<16x128xf32>
    %16 = arith.maximumf %14, %15 : vector<16x128xf32>
    %c0_11 = arith.constant 0 : index
    %c0_12 = arith.constant 0 : index
    %17 = vector.load %arg6[%c0_11, %c0_12] : memref<1x16xf32, #tpu.memory_space<vmem>>, vector<1x16xf32>
    %cst_13 = arith.constant dense<0.000000e+00> : vector<1x128xf32>
    %18 = tpu.matmul %17, %16, %cst_13 {dimension_numbers = #tpu.dot_dimension_numbers<[1], [0], [0], [1], [0, 0, 1, 1], [], []>} : vector<1x16xf32>, vector<16x128xf32>, vector<1x128xf32> -> vector<1x128xf32>
    %c0_14 = arith.constant 0 : index
    %c0_15 = arith.constant 0 : index
    %19 = vector.load %arg7[%c0_14, %c0_15] : memref<1x1xf32, #tpu.memory_space<vmem>>, vector<1x1xf32>
    %20 = vector.broadcast %19 : vector<1x1xf32> to vector<1x128xf32>
    %21 = arith.addf %18, %20 : vector<1x128xf32>
    %c0_16 = arith.constant 0 : index
    %c0_17 = arith.constant 0 : index
    %22 = vector.load %arg8[%c0_16, %c0_17] : memref<1x128xf32, #tpu.memory_space<vmem>>, vector<1x128xf32>
    tpu.vector_store %arg8[%c0_16, %c0_17], %21 {strides = array<i32>} : memref<1x128xf32, #tpu.memory_space<vmem>>, vector<1x128xf32>,
    return
  }
  func.func @transform_0(%arg0: i32) -> (i32, i32) {
    %c0_i32 = arith.constant 0 : i32
    %c0_i32_0 = arith.constant 0 : i32
    return %c0_i32, %arg0 : i32, i32
  }
  func.func @transform_1(%arg0: i32) -> (i32, i32) {
    %c0_i32 = arith.constant 0 : i32
    %c0_i32_0 = arith.constant 0 : i32
    %c0_i32_1 = arith.constant 0 : i32
    return %c0_i32, %c0_i32_0 : i32, i32
  }
  func.func @transform_2(%arg0: i32) -> (i32, i32) {
    %c0_i32 = arith.constant 0 : i32
    %c0_i32_0 = arith.constant 0 : i32
    %c0_i32_1 = arith.constant 0 : i32
    return %c0_i32, %c0_i32_0 : i32, i32
  }
  func.func @transform_3(%arg0: i32) -> (i32, i32) {
    %c0_i32 = arith.constant 0 : i32
    %c0_i32_0 = arith.constant 0 : i32
    %c0_i32_1 = arith.constant 0 : i32
    return %c0_i32, %c0_i32_0 : i32, i32
  }
  func.func @transform_4(%arg0: i32) -> (i32, i32) {
    %c0_i32 = arith.constant 0 : i32
    %c0_i32_0 = arith.constant 0 : i32
    %c0_i32_1 = arith.constant 0 : i32
    return %c0_i32, %c0_i32_0 : i32, i32
  }
  func.func @transform_5(%arg0: i32) -> (i32, i32) {
    %c0_i32 = arith.constant 0 : i32
    %c0_i32_0 = arith.constant 0 : i32
    %c0_i32_1 = arith.constant 0 : i32
    return %c0_i32, %c0_i32_0 : i32, i32
  }
  func.func @transform_6(%arg0: i32) -> (i32, i32) {
    %c0_i32 = arith.constant 0 : i32
    %c0_i32_0 = arith.constant 0 : i32
    %c0_i32_1 = arith.constant 0 : i32
    return %c0_i32, %c0_i32_0 : i32, i32
  }
  func.func @transform_7(%arg0: i32) -> (i32, i32) {
    %c0_i32 = arith.constant 0 : i32
    %c0_i32_0 = arith.constant 0 : i32
    return %c0_i32, %arg0 : i32, i32
  }
}

</mosaic_0001>

<bundles_post_ra>
// kernel: tpu_custom_call.1
= control target key start
LH: loop header
LB: loop body
LE: loop exit
PB: predicated region body
PF: predicated region fallthrough
CT: control target
= control target key end

     0   :  { %s447_s0 = inlined_call_operand.vmem [shape: f32[1,128], index: 0, kind: input, shape index: {}]   ;;  %s448_s1 = inlined_call_operand.vmem [shape: f32[32,1], index: 1, kind: input, shape index: {}]   ;;  %s449_s2 = inlined_call_operand.vmem [shape: f32[32,1], index: 2, kind: input, shape index: {}]   ;;  %s450_s3 = inlined_call_operand.vmem [shape: f32[16,32], index: 3, kind: input, shape index: {}]   ;;  %s451_s4 = inlined_call_operand.vmem [shape: f32[16,1], index: 4, kind: input, shape index: {}]   ;;  %s452_s5 = inlined_call_operand.vmem [shape: f32[1,16], index: 5, kind: input, shape index: {}]   ;;  %s453_s6 = inlined_call_operand.<no memory space> [shape: f32[1,1], index: 6, kind: input, shape index: {}]   ;;  %s454_s7 = inlined_call_operand.hbm [shape: f32[1,128], index: 7, kind: output, shape index: {}]  }
   0x1   :  { %v12_v0 = vstv %s453_s6 }
   0x2   :  { %13 = vst [vmem:[#allocation2] sm:$0x1] %v12_v0 }
   0x3   :  { %v67_v1 = vld [vmem:[%s449_s2 + $0x18] sm:$0xff]  ;;  %v353_v3 = vmov 0   ;;  %v32_v4 = vld [vmem:[%s448_s1 + $0x10] sm:$0xff]  ;;  %v31_v5 = vld [vmem:[%s448_s1 + $0x8] sm:$0xff] }
   0x4   :  { %v33_v2 = vld [vmem:[%s448_s1 + $0x18] sm:$0xff]  ;;  %330 = vset.pattern.permute.xlu1 %v353_v3  ;;  %329 = vset.pattern.permute.xlu0 %v353_v3 }
   0x5   :  { %85 = vperm.xlu1 %330, %v67_v1   ;;  %51 = vperm.xlu0 %329, %v33_v2  }
   0x6   :  { %14 = vsyncpa [#allocation4], 0  ;;  %v66_v6 = vld [vmem:[%s449_s2 + $0x10] sm:$0xff]  ;;  %v30_v7 = vld [vmem:[%s448_s1] sm:$0xff]  ;;  %vm110_vm0 = vcmask 261120   ;;  %v354_v36 = vmov 0.0   ;;  %v201_v46 = vlaneseq }
   0x7   :  { %v65_v8 = vld [vmem:[%s449_s2 + $0x8] sm:$0xff]  ;;  %v64_v9 = vld [vmem:[%s449_s2] sm:$0xff]  ;;  %318 = vmatprep.subr.mxu1 %v354_v36  ;;  %vm355_vm1 = vmmov 0   ;;  %vm205_vm2 = vcmask 130048  }
   0x8   :  { %v99_v10 = vld [vmem:[%s451_s4 + $0x8] sm:$0xff]  ;;  %v98_v11 = vld [vmem:[%s451_s4] sm:$0xff]  ;;  %322 = vmatprep.mubr.msk.f32.mxu1 %vm355_vm1, %v354_v36  ;;  %v202_v47 = vshrl.u32 %v201_v46, 7 }
   0x9   :  { %46 = vperm.xlu0 %329, %v32_v4   ;;  %41 = vperm.xlu1 %330, %v31_v5   ;;  %v96_v12 = vld [vmem:[%s450_s3] sm:$0xff]  ;;  %v97_v35 = vld [vmem:[%s450_s3 + $0x8] sm:$0xff]  ;;  %s356_s3 = smov [#allocation3]  }
   0xa   :  { %315 = vmatprep.mubr.msk.f32.mxu0 %vm110_vm0, %v96_v12  ;;  %v195_v13 = vld [vmem:[#allocation2] sm:$0x1]  ;;  %v203_v48 = vsub.s32 0, %v202_v47  ;;  %s286_s26 = sshll.u32 %s356_s3, 4  ;;  %s287_s26 = int_to_ptr.vmem [resolvable:$true] %s286_s26 }
   0xb   :  { %v294_v14 = vld [vmem:[%s447_s0] ss:$0 sm:$0xff]  ;;  %s331_s27 = scalar_lea.vmem %s287_s26, 16  ;;  %s335_s28 = scalar_lea.vmem %s287_s26, 32 }
   0xc   :  { %v194_v45 = vld [vmem:[%s452_s5] sm:$0x1]  ;;  %p332_p0 = scmp.ne.s32.totalorder %s287_s26, %s331_s27  ;;  %p336_p1 = scmp.lt.s32.totalorder %s287_s26, %s287_s26 }
   0xd   :  { %80 = vperm.xlu0 %329, %v66_v6   ;;  %36 = vperm.xlu1 %330, %v30_v7   ;;  %p337_p2 = scmp.lt.s32.totalorder %s335_s28, %s331_s27 }
   0xf   :  { %p338_p3 = por %p337_p2, %p336_p1 }
  0x11   :  { %75 = vperm.xlu0 %329, %v65_v8   ;;  %70 = vperm.xlu1 %330, %v64_v9   ;;  %p339_p4 = pnand %p338_p3, %p332_p0 }
  0x15   :  { %107 = vperm.xlu0 %329, %v99_v10   ;;  %102 = vperm.xlu1 %330, %v98_v11  }
  0x19   :  { %198 = vperm.xlu0 %329, %v195_v13  }
  0x80   :  { %v86_v15 = vpop.permute.xlu1 %85  ;;  %v52_v16 = vpop.permute.xlu0 %51 }
  0x81   :  { %v63_v17 = vmul.f32 %v294_v14, %v52_v16 }
  0x83   :  { %v91_v18 = vadd.f32 %v86_v15, %v63_v17 }
  0x84   :  { %v47_v19 = vpop.permute.xlu0 %46  ;;  %v42_v20 = vpop.permute.xlu1 %41 }
  0x85   :  { %v95_v21 = vmax.f32 %v91_v18, 0.0  ;;  %v62_v22 = vmul.f32 %v294_v14, %v47_v19  ;;  %v61_v26 = vmul.f32 %v294_v14, %v42_v20 }
  0x87   :  { %307 = vmatprep.subr.mxu0 %v95_v21 }
  0x88   :  { %v81_v23 = vpop.permute.xlu0 %80  ;;  %v37_v24 = vpop.permute.xlu1 %36  ;;  %308 = vmatpush3.msra.mxu0 %v95_v21 }
  0x89   :  { %v90_v25 = vadd.f32 %v81_v23, %v62_v22  ;;  %v60_v28 = vmul.f32 %v294_v14, %v37_v24 }
  0x8b   :  { %v94_v27 = vmax.f32 %v90_v25, 0.0 }
  0x8c   :  { %v76_v29 = vpop.permute.xlu0 %75  ;;  %v71_v30 = vpop.permute.xlu1 %70 }
  0x8d   :  { %v89_v31 = vadd.f32 %v76_v29, %v61_v26  ;;  %v88_v32 = vadd.f32 %v71_v30, %v60_v28  ;;  %309 = vmatprep.subr.mxu0 %v94_v27 }
  0x8e   :  { %310 = vmatpush3.msra.mxu0 %v94_v27 }
  0x8f   :  { %v93_v33 = vmax.f32 %v89_v31, 0.0  ;;  %v92_v34 = vmax.f32 %v88_v32, 0.0 }
  0x90   :  { %v108_v37 = vpop.permute.xlu0 %107  ;;  %v103_v40 = vpop.permute.xlu1 %102 }
  0x91   :  { %311 = vmatprep.subr.mxu0 %v93_v33 }
  0x92   :  { %312 = vmatpush3.msra.mxu0 %v93_v33 }
  0x93   :  { %313 = vmatprep.subr.mxu0 %v92_v34 }
  0x94   :  { %314 = vmatpush3.msra.mxu0 %v92_v34  ;;  %v199_v49 = vpop.permute.xlu0 %198 }
  0x95   :  { %316 = vmatmul.mubr.msk.f32.vlgmr.msra.gmra.mxu0 %vm110_vm0, %v97_v35  ;;  %v204_v50 = vrot.slane %v199_v49, %v203_v48 }
 0x155   :  { %v317_v38 = vpop.f32.mrf.mxu0 }
 0x156   :  { %v189_v39 = vadd.f32 %v317_v38, %v108_v37 }
 0x157   :  { %v183_v41 = vpop.f32.mrf.mxu0 }
 0x158   :  { %v193_v42 = vmax.f32 %v189_v39, 0.0  ;;  %v184_v43 = vadd.f32 %v183_v41, %v103_v40 }
 0x15a   :  { %v192_v44 = vmax.f32 %v184_v43, 0.0  ;;  %319 = vmatpush3.msra.mxu1 %v193_v42 }
 0x15b   :  { %320 = vmatprep.subr.mxu1 %v354_v36 }
 0x15c   :  { %321 = vmatpush3.msra.mxu1 %v192_v44 }
 0x15d   :  { %323 = vmatmul.mubr.msk.f32.vlgmr.msra.gmra.mxu1 %vm205_vm2, %v194_v45 }
 0x21d   :  { %v275_v51 = vpop.f32.mrf.mxu1 }
 0x21e   :  { %v276_v52 = vadd.f32 %v275_v51, %v204_v50 }
 0x21f   :  { %v324_v53 = vpop.f32.mrf.mxu1 }
 0x220   :  { %279 = vst [vmem:[#allocation3] sm:$0x1] %v276_v52 }
 0x221   :  { %342 = shalt.err (!%p339_p4)
}
 0x222   :  { %289 = dma.vmem_to_hbm [thread:$0]  %s287_s26, 16, %s454_s7, [#allocation4]  }
 0x223   :  { %351 = dma.done.wait [#allocation4], 16  }
 0x224   :  { %352 = vsyncadd [#allocation4], 4294967280 }
 0x225   :  { %293 = vsyncpa [#allocation4], 1 }

</bundles_post_ra>
